<compile_context>
chip_gen: v5e
topology: v5e:2x2
jax: 0.10.0
libtpu: 0.0.40
codegen_flags: <defaults>
</compile_context>

<pallas_src>
import functools

import jax
import jax.numpy as jnp
from jax.experimental import pallas as pl
from jax.experimental.pallas import tpu as pltpu


def _round_up(x, m):
    return ((x + m - 1) // m) * m


def _actor_kernel(max_action,
                  x_ref, w1_ref, b1_ref, w2_ref, b2_ref, w3_ref, b3_ref,
                  o_ref):
    # Layer 1: (TB, S) @ (S, 256) + b1 -> relu     (bf16 operands, f32 accum)
    x = x_ref[...].astype(jnp.bfloat16)
    a = jnp.dot(x, w1_ref[...], preferred_element_type=jnp.float32)
    a = jnp.maximum(a + b1_ref[...], 0.0)
    # Layer 2: (TB, 256) @ (256, 256) + b2 -> relu
    a = jnp.dot(a.astype(jnp.bfloat16), w2_ref[...],
                preferred_element_type=jnp.float32)
    a = jnp.maximum(a + b2_ref[...], 0.0)
    # Layer 3: (TB, 256) @ (256, A) + b3 -> max_action * tanh
    a = jnp.dot(a.astype(jnp.bfloat16), w3_ref[...],
                preferred_element_type=jnp.float32)
    a = a + b3_ref[...]
    # NOTE: A is tiny (e.g. 4) so this store is lane-masked; negligible at
    # this size.  If A ever grows, emit a lane-dense (A, TB) layout instead.
    o_ref[...] = (max_action * jnp.tanh(a)).astype(o_ref.dtype)


def actor_forward(state, params, max_action, *, block_b=2048):
    """state: (B, state_dim) f32; params: dict of (in,out) weights and (1,out) biases.

    Weights are cast to bf16 for the MXU; accumulation and nonlinearities run
    in f32.  Returns (B, action_dim) f32.
    """
    w1 = params["w1"].astype(jnp.bfloat16)
    w2 = params["w2"].astype(jnp.bfloat16)
    w3 = params["w3"].astype(jnp.bfloat16)
    b1 = params["b1"].astype(jnp.float32)
    b2 = params["b2"].astype(jnp.float32)
    b3 = params["b3"].astype(jnp.float32)

    B, S = state.shape
    H = w1.shape[1]
    A = w3.shape[1]

    # ---- batch tile selection -------------------------------------------
    # Enough tiles to respect block_b, at least 2 tiles for mid/large batches
    # (so v7x megacore has work on both TCs), balanced so the padded tail of
    # the last tile is < 8 rows.
    num_tiles = pl.cdiv(B, block_b)
    if B >= 512:
        num_tiles = max(num_tiles, 2)
    tb = _round_up(pl.cdiv(B, num_tiles), 8)
    grid_n = pl.cdiv(B, tb)

    # ---- VMEM budget ------------------------------------------------------
    # Double-buffered state/out blocks + resident weights + in-kernel f32/bf16
    # activation temps (generous), with 1.5x margin; capped well below v7x's
    # 64 MiB physical VMEM.
    io_bytes = 2 * tb * (S + A) * 4
    wt_bytes = 2 * ((S * H + H * H + H * A) * 2 + (2 * H + A) * 4)
    tmp_bytes = 6 * tb * H * 4
    vmem_limit = int(min(max((io_bytes + wt_bytes + tmp_bytes) * 3 // 2,
                             16 * 1024 * 1024),
                         48 * 1024 * 1024))

    # Streamed along the batch grid (last, partial block is masked by Pallas).
    state_spec = pl.BlockSpec((tb, S), lambda i: (i, 0))
    out_spec = pl.BlockSpec((tb, A), lambda i: (i, 0))
    # Weights/biases: same block every grid step -> DMA'd once, VMEM-resident.
    resident = lambda shape: pl.BlockSpec(shape, lambda i: (0, 0))

    kernel = functools.partial(_actor_kernel, float(max_action))
    out = pl.pallas_call(
        kernel,
        out_shape=jax.ShapeDtypeStruct((B, A), jnp.float32),
        grid_spec=pltpu.PrefetchScalarGridSpec(
            num_scalar_prefetch=0,
            grid=(grid_n,),
            in_specs=[
                state_spec,
                resident((S, H)), resident((1, H)),
                resident((H, H)), resident((1, H)),
                resident((H, A)), resident((1, A)),
            ],
            out_specs=out_spec,
        ),
        compiler_params=pltpu.CompilerParams(
            # Batch tiles are independent -> shard across v7x's 2 TensorCores.
            dimension_semantics=("parallel",),
            vmem_limit_bytes=vmem_limit,
        ),
    )(state, w1, b1, w2, b2, w3, b3)

    return out


def init_actor_params(key, state_dim, action_dim, hidden=256):
    """Deterministic synthetic init (roughly PyTorch Linear's uniform fan-in scale)."""
    ks = jax.random.split(key, 6)

    def lin(kw, kb, fan_in, fan_out):
        bound = 1.0 / jnp.sqrt(fan_in)
        w = jax.random.uniform(kw, (fan_in, fan_out), jnp.float32, -bound, bound)
        b = jax.random.uniform(kb, (1, fan_out), jnp.float32, -bound, bound)
        return w, b

    w1, b1 = lin(ks[0], ks[1], state_dim, hidden)
    w2, b2 = lin(ks[2], ks[3], hidden, hidden)
    w3, b3 = lin(ks[4], ks[5], hidden, action_dim)
    return {"w1": w1, "b1": b1, "w2": w2, "b2": b2, "w3": w3, "b3": b3}


def _ref_bf16(x, p, max_action):
    """Pure-JAX reference with the SAME numerics (bf16 matmul operands, f32 accum)."""
    w1 = p["w1"].astype(jnp.bfloat16)
    w2 = p["w2"].astype(jnp.bfloat16)
    w3 = p["w3"].astype(jnp.bfloat16)
    a = jnp.dot(x.astype(jnp.bfloat16), w1, preferred_element_type=jnp.float32)
    a = jnp.maximum(a + p["b1"], 0.0)
    a = jnp.dot(a.astype(jnp.bfloat16), w2, preferred_element_type=jnp.float32)
    a = jnp.maximum(a + p["b2"], 0.0)
    a = jnp.dot(a.astype(jnp.bfloat16), w3, preferred_element_type=jnp.float32)
    return max_action * jnp.tanh(a + p["b3"])


def _ref_f32(x, p, max_action):
    """Full-f32 reference of the original PyTorch math (coarse sanity check)."""
    a = jnp.maximum(x @ p["w1"] + p["b1"], 0.0)
    a = jnp.maximum(a @ p["w2"] + p["b2"], 0.0)
    return max_action * jnp.tanh(a @ p["w3"] + p["b3"])


if __name__ == "__main__":
    key = jax.random.PRNGKey(0)
    k_param, k1, k2, k3 = jax.random.split(key, 4)

    state_dim = 16
    action_dim = 4
    max_action = 2.0
    params = init_actor_params(k_param, state_dim, action_dim)

    def check(batch, k):
        state = jax.random.normal(k, (batch, state_dim), jnp.float32)
        out = jax.block_until_ready(actor_forward(state, params, max_action))
        assert out.shape == (batch, action_dim)
        assert jnp.allclose(out, _ref_bf16(state, params, max_action),
                            atol=1e-4, rtol=1e-4)
        assert jnp.allclose(out, _ref_f32(state, params, max_action),
                            atol=5e-2, rtol=5e-2)

    # Case 1: tiny batch (single small tile, tb = 8).
    check(8, k1)
    # Case 2: non-multiple-of-8 batch -> single tile with masked trailing rows.
    check(300, k2)
    # Case 3: batch large enough to trigger >=2 balanced tiles (tb = 752,
    # grid = 2, last block partially masked) exercising the parallel grid.
    check(1500, k3)

    print("KERNEL_OK")
</pallas_src>

<mosaic_0001>
module attributes {stable_mosaic.version = 11 : i64} {
  func.func @_actor_kernel(%arg0: i32, %arg1: memref<8x16xf32, #tpu.memory_space<vmem>>, %arg2: memref<16x256xbf16, #tpu.memory_space<vmem>>, %arg3: memref<1x256xf32, #tpu.memory_space<vmem>>, %arg4: memref<256x256xbf16, #tpu.memory_space<vmem>>, %arg5: memref<1x256xf32, #tpu.memory_space<vmem>>, %arg6: memref<256x4xbf16, #tpu.memory_space<vmem>>, %arg7: memref<1x4xf32, #tpu.memory_space<vmem>>, %arg8: memref<8x4xf32, #tpu.memory_space<vmem>>) attributes {dimension_semantics = [#tpu.dimension_semantics<parallel>], iteration_bounds = array<i64: 1>, scalar_prefetch = 0 : i64, scratch_operands = 0 : i64, tpu.core_type = #tpu.core_type<tc>, window_params = [{transform_indices = @transform_0, window_bounds = array<i64: 8, 16>}, {pipeline_mode = #tpu.pipeline_mode<synchronous>, transform_indices = @transform_1, window_bounds = array<i64: 16, 256>}, {pipeline_mode = #tpu.pipeline_mode<synchronous>, transform_indices = @transform_2, window_bounds = array<i64: 1, 256>}, {pipeline_mode = #tpu.pipeline_mode<synchronous>, transform_indices = @transform_3, window_bounds = array<i64: 256, 256>}, {pipeline_mode = #tpu.pipeline_mode<synchronous>, transform_indices = @transform_4, window_bounds = array<i64: 1, 256>}, {pipeline_mode = #tpu.pipeline_mode<synchronous>, transform_indices = @transform_5, window_bounds = array<i64: 256, 4>}, {pipeline_mode = #tpu.pipeline_mode<synchronous>, transform_indices = @transform_6, window_bounds = array<i64: 1, 4>}, {transform_indices = @transform_7, window_bounds = array<i64: 8, 4>}]} {
    %c0 = arith.constant 0 : index
    %c0_0 = arith.constant 0 : index
    %0 = vector.load %arg1[%c0, %c0_0] : memref<8x16xf32, #tpu.memory_space<vmem>>, vector<8x16xf32>
    %1 = arith.truncf %0 : vector<8x16xf32> to vector<8x16xbf16>
    %c0_1 = arith.constant 0 : index
    %c0_2 = arith.constant 0 : index
    %2 = vector.load %arg2[%c0_1, %c0_2] : memref<16x256xbf16, #tpu.memory_space<vmem>>, vector<16x256xbf16>
    %cst = arith.constant dense<0.000000e+00> : vector<8x256xf32>
    %3 = tpu.matmul %1, %2, %cst {dimension_numbers = #tpu.dot_dimension_numbers<[1], [0], [0], [1], [0, 0, 1, 1], [], []>} : vector<8x16xbf16>, vector<16x256xbf16>, vector<8x256xf32> -> vector<8x256xf32>
    %c0_3 = arith.constant 0 : index
    %c0_4 = arith.constant 0 : index
    %4 = vector.load %arg3[%c0_3, %c0_4] : memref<1x256xf32, #tpu.memory_space<vmem>>, vector<1x256xf32>
    %5 = vector.broadcast %4 : vector<1x256xf32> to vector<8x256xf32>
    %6 = arith.addf %3, %5 : vector<8x256xf32>
    %cst_5 = arith.constant 0.000000e+00 : f32
    %7 = vector.broadcast %cst_5 : f32 to vector<8x256xf32>
    %8 = arith.maximumf %6, %7 : vector<8x256xf32>
    %9 = arith.truncf %8 : vector<8x256xf32> to vector<8x256xbf16>
    %c0_6 = arith.constant 0 : index
    %c0_7 = arith.constant 0 : index
    %10 = vector.load %arg4[%c0_6, %c0_7] : memref<256x256xbf16, #tpu.memory_space<vmem>>, vector<256x256xbf16>
    %cst_8 = arith.constant dense<0.000000e+00> : vector<8x256xf32>
    %11 = tpu.matmul %9, %10, %cst_8 {dimension_numbers = #tpu.dot_dimension_numbers<[1], [0], [0], [1], [0, 0, 1, 1], [], []>} : vector<8x256xbf16>, vector<256x256xbf16>, vector<8x256xf32> -> vector<8x256xf32>
    %c0_9 = arith.constant 0 : index
    %c0_10 = arith.constant 0 : index
    %12 = vector.load %arg5[%c0_9, %c0_10] : memref<1x256xf32, #tpu.memory_space<vmem>>, vector<1x256xf32>
    %13 = vector.broadcast %12 : vector<1x256xf32> to vector<8x256xf32>
    %14 = arith.addf %11, %13 : vector<8x256xf32>
    %cst_11 = arith.constant 0.000000e+00 : f32
    %15 = vector.broadcast %cst_11 : f32 to vector<8x256xf32>
    %16 = arith.maximumf %14, %15 : vector<8x256xf32>
    %17 = arith.truncf %16 : vector<8x256xf32> to vector<8x256xbf16>
    %c0_12 = arith.constant 0 : index
    %c0_13 = arith.constant 0 : index
    %18 = vector.load %arg6[%c0_12, %c0_13] : memref<256x4xbf16, #tpu.memory_space<vmem>>, vector<256x4xbf16>
    %cst_14 = arith.constant dense<0.000000e+00> : vector<8x4xf32>
    %19 = tpu.matmul %17, %18, %cst_14 {dimension_numbers = #tpu.dot_dimension_numbers<[1], [0], [0], [1], [0, 0, 1, 1], [], []>} : vector<8x256xbf16>, vector<256x4xbf16>, vector<8x4xf32> -> vector<8x4xf32>
    %c0_15 = arith.constant 0 : index
    %c0_16 = arith.constant 0 : index
    %20 = vector.load %arg7[%c0_15, %c0_16] : memref<1x4xf32, #tpu.memory_space<vmem>>, vector<1x4xf32>
    %21 = vector.broadcast %20 : vector<1x4xf32> to vector<8x4xf32>
    %22 = arith.addf %19, %21 : vector<8x4xf32>
    %23 = math.tanh %22 : vector<8x4xf32>
    %cst_17 = arith.constant 2.000000e+00 : f32
    %24 = vector.broadcast %cst_17 : f32 to vector<8x4xf32>
    %25 = arith.mulf %24, %23 : vector<8x4xf32>
    %c0_18 = arith.constant 0 : index
    %c0_19 = arith.constant 0 : index
    %26 = vector.load %arg8[%c0_18, %c0_19] : memref<8x4xf32, #tpu.memory_space<vmem>>, vector<8x4xf32>
    tpu.vector_store %arg8[%c0_18, %c0_19], %25 {strides = array<i32>} : memref<8x4xf32, #tpu.memory_space<vmem>>, vector<8x4xf32>,
    return
  }
  func.func @transform_0(%arg0: i32) -> (i32, i32) {
    %c0_i32 = arith.constant 0 : i32
    %c0_i32_0 = arith.constant 0 : i32
    return %arg0, %c0_i32 : i32, i32
  }
  func.func @transform_1(%arg0: i32) -> (i32, i32) {
    %c0_i32 = arith.constant 0 : i32
    %c0_i32_0 = arith.constant 0 : i32
    %c0_i32_1 = arith.constant 0 : i32
    return %c0_i32, %c0_i32_0 : i32, i32
  }
  func.func @transform_2(%arg0: i32) -> (i32, i32) {
    %c0_i32 = arith.constant 0 : i32
    %c0_i32_0 = arith.constant 0 : i32
    %c0_i32_1 = arith.constant 0 : i32
    return %c0_i32, %c0_i32_0 : i32, i32
  }
  func.func @transform_3(%arg0: i32) -> (i32, i32) {
    %c0_i32 = arith.constant 0 : i32
    %c0_i32_0 = arith.constant 0 : i32
    %c0_i32_1 = arith.constant 0 : i32
    return %c0_i32, %c0_i32_0 : i32, i32
  }
  func.func @transform_4(%arg0: i32) -> (i32, i32) {
    %c0_i32 = arith.constant 0 : i32
    %c0_i32_0 = arith.constant 0 : i32
    %c0_i32_1 = arith.constant 0 : i32
    return %c0_i32, %c0_i32_0 : i32, i32
  }
  func.func @transform_5(%arg0: i32) -> (i32, i32) {
    %c0_i32 = arith.constant 0 : i32
    %c0_i32_0 = arith.constant 0 : i32
    %c0_i32_1 = arith.constant 0 : i32
    return %c0_i32, %c0_i32_0 : i32, i32
  }
  func.func @transform_6(%arg0: i32) -> (i32, i32) {
    %c0_i32 = arith.constant 0 : i32
    %c0_i32_0 = arith.constant 0 : i32
    %c0_i32_1 = arith.constant 0 : i32
    return %c0_i32, %c0_i32_0 : i32, i32
  }
  func.func @transform_7(%arg0: i32) -> (i32, i32) {
    %c0_i32 = arith.constant 0 : i32
    %c0_i32_0 = arith.constant 0 : i32
    return %arg0, %c0_i32 : i32, i32
  }
}

</mosaic_0001>

<bundles_post_ra>
// kernel: tpu_custom_call.1
= control target key start
LH: loop header
LB: loop body
LE: loop exit
PB: predicated region body
PF: predicated region fallthrough
CT: control target
= control target key end

     0   :  { %12 = vsyncpa [#allocation3], 0  ;;  %s802_s27 = smov [#allocation2]   ;;  %s803_s29 = smov 128   ;;  %s925_s0 = inlined_call_operand.vmem [shape: f32[8,16], index: 0, kind: input, shape index: {}]   ;;  %s926_s1 = inlined_call_operand.vmem [shape: bf16[16,256], index: 1, kind: input, shape index: {}]   ;;  %s927_s2 = inlined_call_operand.vmem [shape: f32[1,256], index: 2, kind: input, shape index: {}]   ;;  %s928_s3 = inlined_call_operand.hbm [shape: bf16[256,256], index: 3, kind: input, shape index: {}]   ;;  %s929_s4 = inlined_call_operand.vmem [shape: f32[1,256], index: 4, kind: input, shape index: {}]   ;;  %s930_s5 = inlined_call_operand.vmem [shape: bf16[256,4], index: 5, kind: input, shape index: {}]   ;;  %s931_s6 = inlined_call_operand.vmem [shape: f32[1,4], index: 6, kind: input, shape index: {}]   ;;  %s932_s7 = inlined_call_operand.vmem [shape: f32[8,4], index: 7, kind: output, shape index: {}]  }
   0x1   :  { %s23_s26 = sshll.u32 %s928_s3, 4  ;;  %s25_s28 = sshll.u32 %s802_s27, 4  ;;  %s24_s26 = int_to_ptr.hbm [resolvable:$true] %s23_s26  ;;  %s26_s28 = int_to_ptr.vmem [resolvable:$true] %s25_s28 }
   0x2   :  { %s804_s30 = smov 8  }
   0x3   :  { %31 = dma.hbm_to_vmem [thread:$0]  %s24_s26, 4096, %s26_s28, [#allocation3], %s803_s29, %s803_s29, %s804_s30  }
   0x4   :  { %800 = dma.done.wait [#allocation3], 4096  }
   0x5   :  { %801 = vsyncadd [#allocation3], 4294963200  ;;  %v520_v0 = vld [vmem:[%s926_s1] sm:$0xf]  ;;  %v721_v1 = vld [vmem:[%s926_s1 + $0x4] sm:$0xf0] }
   0x6   :  { %v720_v2 = vld [vmem:[%s926_s1 + $0x4] sm:$0xf]  ;;  %v521_v3 = vor.u32 %v721_v1, %v520_v0  ;;  %v522_v4 = vld [vmem:[%s926_s1 + $0x8] sm:$0xf0]  ;;  %vm63_vm0 = vcmask 130048   ;;  %vm511_vm1 = vcmask 31744  }
   0x7   :  { %v43_v5 = vld [vmem:[%s925_s0] sm:$0xff]  ;;  %v586_v6 = vld [vmem:[#allocation2 + $0x70] sm:$0xf]  ;;  %v525_v7 = vor.u32 %v720_v2, %v522_v4  ;;  %v737_v9 = vld [vmem:[#allocation2 + $0x74] sm:$0xf0] }
   0x8   :  { %v44_v8 = vpack.c.bf16 %v43_v5, %v43_v5  ;;  %v650_v10 = vld [vmem:[#allocation2 + $0xf0] sm:$0xf]  ;;  %v753_v11 = vld [vmem:[#allocation2 + $0xf4] sm:$0xf0]  ;;  %74 = vmatpush.bf16.msra.mxu0 %v521_v3  ;;  %v587_v12 = vor.u32 %v737_v9, %v586_v6  ;;  %v736_v14 = vld [vmem:[#allocation2 + $0x74] sm:$0xf] }
   0x9   :  { %v651_v13 = vor.u32 %v753_v11, %v650_v10  ;;  %v588_v15 = vld [vmem:[#allocation2 + $0x78] sm:$0xf0]  ;;  %v752_v16 = vld [vmem:[#allocation2 + $0xf4] sm:$0xf]  ;;  %87 = vmatpush.bf16.msra.mxu1 %v525_v7  ;;  %v578_v19 = vld [vmem:[#allocation2 + $0x60] sm:$0xf] }
   0xa   :  { %v591_v17 = vor.u32 %v736_v14, %v588_v15  ;;  %v652_v18 = vld [vmem:[#allocation2 + $0xf8] sm:$0xf0]  ;;  %v735_v20 = vld [vmem:[#allocation2 + $0x64] sm:$0xf0]  ;;  %295 = vmatpush.bf16.msra.mxu2 %v587_v12  ;;  %v642_v23 = vld [vmem:[#allocation2 + $0xe0] sm:$0xf] }
   0xb   :  { %308 = vmatpush.bf16.msra.mxu3 %v651_v13  ;;  %v655_v21 = vor.u32 %v752_v16, %v652_v18  ;;  %v579_v22 = vor.u32 %v735_v20, %v578_v19  ;;  %v751_v24 = vld [vmem:[#allocation2 + $0xe4] sm:$0xf0]  ;;  %v734_v25 = vld [vmem:[#allocation2 + $0x64] sm:$0xf]  ;;  %526 = vmatmul.msk.bf16.vlgmr.msra.gmra.mxu0 %vm63_vm0, %v44_v8  ;;  %v580_v27 = vld [vmem:[#allocation2 + $0x68] sm:$0xf0] }
   0xc   :  { %v643_v26 = vor.u32 %v751_v24, %v642_v23  ;;  %v750_v28 = vld [vmem:[#allocation2 + $0xe4] sm:$0xf]  ;;  %v644_v29 = vld [vmem:[#allocation2 + $0xe8] sm:$0xf0]  ;;  %527 = vmatmul.msk.bf16.vlgmr.msra.gmra.mxu1 %vm63_vm0, %v44_v8  ;;  %321 = vmatpush.bf16.msrb.mxu0 %v591_v17  ;;  %v583_v30 = vor.u32 %v734_v25, %v580_v27  ;;  %v570_v31 = vld [vmem:[#allocation2 + $0x50] sm:$0xf] }
   0xd   :  { %v733_v32 = vld [vmem:[#allocation2 + $0x54] sm:$0xf0]  ;;  %v634_v33 = vld [vmem:[#allocation2 + $0xd0] sm:$0xf]  ;;  %334 = vmatpush.bf16.msrb.mxu1 %v655_v21  ;;  %v647_v34 = vor.u32 %v750_v28, %v644_v29  ;;  %v732_v36 = vld [vmem:[#allocation2 + $0x54] sm:$0xf] }
   0xe   :  { %v749_v35 = vld [vmem:[#allocation2 + $0xd4] sm:$0xf0]  ;;  %v572_v37 = vld [vmem:[#allocation2 + $0x58] sm:$0xf0]  ;;  %296 = vmatpush.bf16.msra.mxu2 %v579_v22  ;;  %v571_v38 = vor.u32 %v733_v32, %v570_v31  ;;  %v748_v40 = vld [vmem:[#allocation2 + $0xd4] sm:$0xf] }
   0xf   :  { %309 = vmatpush.bf16.msra.mxu3 %v643_v26  ;;  %v635_v39 = vor.u32 %v749_v35, %v634_v33  ;;  %v636_v41 = vld [vmem:[#allocation2 + $0xd8] sm:$0xf0]  ;;  %v562_v42 = vld [vmem:[#allocation2 + $0x40] sm:$0xf]  ;;  %v731_v43 = vld [vmem:[#allocation2 + $0x44] sm:$0xf0]  ;;  %v575_v46 = vor.u32 %v732_v36, %v572_v37 }
  0x10   :  { %v626_v44 = vld [vmem:[#allocation2 + $0xc0] sm:$0xf]  ;;  %v747_v45 = vld [vmem:[#allocation2 + $0xc4] sm:$0xf0]  ;;  %322 = vmatpush.bf16.msrb.mxu0 %v583_v30  ;;  %v639_v47 = vor.u32 %v748_v40, %v636_v41  ;;  %v730_v48 = vld [vmem:[#allocation2 + $0x44] sm:$0xf]  ;;  %v563_v50 = vor.u32 %v731_v43, %v562_v42 }
  0x11   :  { %335 = vmatpush.bf16.msrb.mxu1 %v647_v34  ;;  %v564_v49 = vld [vmem:[#allocation2 + $0x48] sm:$0xf0]  ;;  %v627_v51 = vor.u32 %v747_v45, %v626_v44  ;;  %v746_v52 = vld [vmem:[#allocation2 + $0xc4] sm:$0xf]  ;;  %v554_v54 = vld [vmem:[#allocation2 + $0x30] sm:$0xf] }
  0x12   :  { %297 = vmatpush.bf16.msra.mxu2 %v571_v38  ;;  %v628_v53 = vld [vmem:[#allocation2 + $0xc8] sm:$0xf0]  ;;  %v729_v55 = vld [vmem:[#allocation2 + $0x34] sm:$0xf0]  ;;  %v618_v56 = vld [vmem:[#allocation2 + $0xb0] sm:$0xf]  ;;  %v567_v58 = vor.u32 %v730_v48, %v564_v49 }
  0x13   :  { %310 = vmatpush.bf16.msra.mxu3 %v635_v39  ;;  %v745_v57 = vld [vmem:[#allocation2 + $0xb4] sm:$0xf0]  ;;  %v631_v59 = vor.u32 %v746_v52, %v628_v53  ;;  %v728_v60 = vld [vmem:[#allocation2 + $0x34] sm:$0xf]  ;;  %v556_v61 = vld [vmem:[#allocation2 + $0x38] sm:$0xf0]  ;;  %v555_v63 = vor.u32 %v729_v55, %v554_v54 }
  0x14   :  { %323 = vmatpush.bf16.msrb.mxu0 %v575_v46  ;;  %v744_v62 = vld [vmem:[#allocation2 + $0xb4] sm:$0xf]  ;;  %v619_v0 = vor.u32 %v745_v57, %v618_v56  ;;  %v620_v1 = vld [vmem:[#allocation2 + $0xb8] sm:$0xf0]  ;;  %v546_v2 = vld [vmem:[#allocation2 + $0x20] sm:$0xf]  ;;  %v559_v6 = vor.u32 %v728_v60, %v556_v61 }
  0x15   :  { %336 = vmatpush.bf16.msrb.mxu1 %v639_v47  ;;  %v727_v3 = vld [vmem:[#allocation2 + $0x24] sm:$0xf0]  ;;  %v610_v4 = vld [vmem:[#allocation2 + $0xa0] sm:$0xf]  ;;  %v623_v7 = vor.u32 %v744_v62, %v620_v1  ;;  %v726_v8 = vld [vmem:[#allocation2 + $0x24] sm:$0xf] }
  0x16   :  { %298 = vmatpush.bf16.msra.mxu2 %v563_v50  ;;  %v743_v5 = vld [vmem:[#allocation2 + $0xa4] sm:$0xf0]  ;;  %v548_v9 = vld [vmem:[#allocation2 + $0x28] sm:$0xf0]  ;;  %v547_v10 = vor.u32 %v727_v3, %v546_v2  ;;  %v742_v12 = vld [vmem:[#allocation2 + $0xa4] sm:$0xf] }
  0x17   :  { %311 = vmatpush.bf16.msra.mxu3 %v627_v51  ;;  %v611_v11 = vor.u32 %v743_v5, %v610_v4  ;;  %v612_v13 = vld [vmem:[#allocation2 + $0xa8] sm:$0xf0]  ;;  %v551_v14 = vor.u32 %v726_v8, %v548_v9  ;;  %v538_v16 = vld [vmem:[#allocation2 + $0x10] sm:$0xf]  ;;  %v725_v17 = vld [vmem:[#allocation2 + $0x14] sm:$0xf0] }
  0x18   :  { %324 = vmatpush.bf16.msrb.mxu0 %v567_v58  ;;  %v615_v15 = vor.u32 %v742_v12, %v612_v13  ;;  %v602_v18 = vld [vmem:[#allocation2 + $0x90] sm:$0xf]  ;;  %v539_v19 = vor.u32 %v725_v17, %v538_v16  ;;  %v741_v20 = vld [vmem:[#allocation2 + $0x94] sm:$0xf0]  ;;  %v724_v21 = vld [vmem:[#allocation2 + $0x14] sm:$0xf] }
  0x19   :  { %337 = vmatpush.bf16.msrb.mxu1 %v631_v59  ;;  %v540_v22 = vld [vmem:[#allocation2 + $0x18] sm:$0xf0]  ;;  %v603_v23 = vor.u32 %v741_v20, %v602_v18  ;;  %v740_v25 = vld [vmem:[#allocation2 + $0x94] sm:$0xf]  ;;  %v530_v28 = vld [vmem:[#allocation2] sm:$0xf] }
  0x1a   :  { %299 = vmatpush.bf16.msra.mxu2 %v555_v63  ;;  %v543_v24 = vor.u32 %v724_v21, %v540_v22  ;;  %v604_v26 = vld [vmem:[#allocation2 + $0x98] sm:$0xf0]  ;;  %v723_v29 = vld [vmem:[#allocation2 + $0x4] sm:$0xf0]  ;;  %v594_v30 = vld [vmem:[#allocation2 + $0x80] sm:$0xf] }
  0x1b   :  { %312 = vmatpush.bf16.msra.mxu3 %v619_v0  ;;  %v607_v27 = vor.u32 %v740_v25, %v604_v26  ;;  %v531_v31 = vor.u32 %v723_v29, %v530_v28  ;;  %v739_v32 = vld [vmem:[#allocation2 + $0x84] sm:$0xf0]  ;;  %v722_v33 = vld [vmem:[#allocation2 + $0x4] sm:$0xf]  ;;  %v532_v34 = vld [vmem:[#allocation2 + $0x8] sm:$0xf0] }
  0x1c   :  { %325 = vmatpush.bf16.msrb.mxu0 %v559_v6  ;;  %v595_v35 = vor.u32 %v739_v32, %v594_v30  ;;  %v535_v36 = vor.u32 %v722_v33, %v532_v34  ;;  %v738_v37 = vld [vmem:[#allocation2 + $0x84] sm:$0xf]  ;;  %v596_v38 = vld [vmem:[#allocation2 + $0x88] sm:$0xf0]  ;;  %v769_v40 = vld [vmem:[%s930_s5 + $0x78] sm:$0xff] }
  0x1d   :  { %338 = vmatpush.bf16.msrb.mxu1 %v623_v7  ;;  %v599_v39 = vor.u32 %v738_v37, %v596_v38  ;;  %v761_v41 = vld [vmem:[%s930_s5 + $0x38] sm:$0xff]  ;;  %v768_v42 = vld [vmem:[%s930_s5 + $0x70] sm:$0xff]  ;;  %v767_v44 = vld [vmem:[%s930_s5 + $0x68] sm:$0xff] }
  0x1e   :  { %300 = vmatpush.bf16.msra.mxu2 %v547_v10  ;;  %v760_v43 = vld [vmem:[%s930_s5 + $0x30] sm:$0xff]  ;;  %v759_v45 = vld [vmem:[%s930_s5 + $0x28] sm:$0xff]  ;;  %v766_v46 = vld [vmem:[%s930_s5 + $0x60] sm:$0xff] }
  0x1f   :  { %313 = vmatpush.bf16.msra.mxu3 %v611_v11  ;;  %v758_v47 = vld [vmem:[%s930_s5 + $0x20] sm:$0xff]  ;;  %v765_v48 = vld [vmem:[%s930_s5 + $0x58] sm:$0xff]  ;;  %v764_v50 = vld [vmem:[%s930_s5 + $0x50] sm:$0xff] }
  0x20   :  { %326 = vmatpush.bf16.msrb.mxu0 %v551_v14  ;;  %v47_v49 = vld [vmem:[%s927_s2] sm:$0x3]  ;;  %v757_v63 = vld [vmem:[%s930_s5 + $0x18] sm:$0xff]  ;;  %v763_v0 = vld [vmem:[%s930_s5 + $0x48] sm:$0xff] }
  0x21   :  { %339 = vmatpush.bf16.msrb.mxu1 %v615_v15  ;;  %v49_v51 = vperm.slane %v47_v49, 0  ;;  %v50_v52 = vperm.slane %v47_v49, 1  ;;  %v756_v1 = vld [vmem:[%s930_s5 + $0x10] sm:$0xff]  ;;  %v762_v2 = vld [vmem:[%s930_s5 + $0x40] sm:$0xff]  ;;  %v755_v3 = vld [vmem:[%s930_s5 + $0x8] sm:$0xff] }
  0x22   :  { %301 = vmatpush.bf16.msra.mxu2 %v539_v19  ;;  %v754_v4 = vld [vmem:[%s930_s5] sm:$0xff] }
  0x23   :  { %314 = vmatpush.bf16.msra.mxu3 %v603_v23  ;;  %v129_v5 = vld [vmem:[%s929_s4] sm:$0x3] }
  0x24   :  { %327 = vmatpush.bf16.msrb.mxu0 %v543_v24  ;;  %v132_v6 = vperm.slane %v129_v5, 1  ;;  %v131_v11 = vperm.slane %v129_v5, 0  ;;  %v773_v25 = vld [vmem:[%s931_s6] ss:$0 sm:$0xff] }
  0x25   :  { %340 = vmatpush.bf16.msrb.mxu1 %v607_v27 }
  0x26   :  { %302 = vmatpush.bf16.msra.mxu2 %v531_v31 }
  0x27   :  { %315 = vmatpush.bf16.msra.mxu3 %v595_v35 }
  0x28   :  { %328 = vmatpush.bf16.msrb.mxu0 %v535_v36 }
  0x29   :  { %341 = vmatpush.bf16.msrb.mxu1 %v599_v39 }
  0x2a   :  { %483 = vmatpush.bf16.msrb.mxu2 %v761_v41 }
  0x2b   :  { %496 = vmatpush.bf16.msrb.mxu3 %v769_v40 }
  0x2e   :  { %484 = vmatpush.bf16.msrb.mxu2 %v760_v43 }
  0x2f   :  { %497 = vmatpush.bf16.msrb.mxu3 %v768_v42 }
  0x32   :  { %485 = vmatpush.bf16.msrb.mxu2 %v759_v45 }
  0x33   :  { %498 = vmatpush.bf16.msrb.mxu3 %v767_v44 }
  0x36   :  { %486 = vmatpush.bf16.msrb.mxu2 %v758_v47 }
  0x37   :  { %499 = vmatpush.bf16.msrb.mxu3 %v766_v46 }
  0x3a   :  { %487 = vmatpush.bf16.msrb.mxu2 %v757_v63 }
  0x3b   :  { %500 = vmatpush.bf16.msrb.mxu3 %v765_v48 }
  0x3e   :  { %488 = vmatpush.bf16.msrb.mxu2 %v756_v1 }
  0x3f   :  { %501 = vmatpush.bf16.msrb.mxu3 %v764_v50 }
  0x42   :  { %489 = vmatpush.bf16.msrb.mxu2 %v755_v3 }
  0x43   :  { %502 = vmatpush.bf16.msrb.mxu3 %v763_v0 }
  0x46   :  { %490 = vmatpush.bf16.msrb.mxu2 %v754_v4 }
  0x47   :  { %503 = vmatpush.bf16.msrb.mxu3 %v762_v2 }
  0x88   :  { %v76_v53 = vpop.f32.mrf.mxu0 }
  0x89   :  { %v77_v54 = vadd.f32 %v76_v53, %v49_v51  ;;  %v89_v55 = vpop.f32.mrf.mxu1 }
  0x8a   :  { %v90_v56 = vadd.f32 %v89_v55, %v50_v52 }
  0x8b   :  { %v93_v57 = vmax.f32 %v77_v54, 0.0 }
  0x8c   :  { %v94_v58 = vmax.f32 %v90_v56, 0.0 }
  0x8d   :  { %v95_v59 = vpack.c.bf16 %v93_v57, %v93_v57 }
  0x8e   :  { %v96_v60 = vpack.c.bf16 %v94_v58, %v94_v58 }
  0x8f   :  { %303 = vmatmul.bf16.vlgmr.msra.gmra.mxu2 %v95_v59  ;;  %329 = vmatmul.bf16.vlgmr.msrb.gmra.mxu0 %v95_v59 }
  0x90   :  { %316 = vmatmul.bf16.vlgmr.msra.gmra.mxu3 %v96_v60  ;;  %342 = vmatmul.bf16.vlgmr.msrb.gmra.mxu1 %v96_v60  ;;  %v78_v61 = vpop.f32.mrf.mxu0 }
  0x91   :  { %v91_v62 = vpop.f32.mrf.mxu1 }
 0x10c   :  { %v330_v7 = vpop.f32.mrf.mxu0 }
 0x10d   :  { %v331_v8 = vadd.f32 %v330_v7, %v132_v6  ;;  %v343_v9 = vpop.f32.mrf.mxu1 }
 0x10f   :  { %v344_v10 = vadd.f32 %v343_v9, %v331_v8 }
 0x111   :  { %v348_v12 = vmax.f32 %v344_v10, 0.0 }
 0x112   :  { %v304_v13 = vpop.f32.mrf.mxu2 }
 0x113   :  { %v350_v14 = vpack.c.bf16 %v348_v12, %v348_v12  ;;  %v305_v15 = vadd.f32 %v304_v13, %v131_v11  ;;  %v317_v16 = vpop.f32.mrf.mxu3 }
 0x114   :  { %v332_v17 = vpop.f32.mrf.mxu0 }
 0x115   :  { %v318_v18 = vadd.f32 %v317_v16, %v305_v15  ;;  %v345_v19 = vpop.f32.mrf.mxu1  ;;  %504 = vmatmul.bf16.vlgmr.msrb.gmra.mxu3 %v350_v14 }
 0x117   :  { %v347_v20 = vmax.f32 %v318_v18, 0.0 }
 0x119   :  { %v349_v21 = vpack.c.bf16 %v347_v20, %v347_v20 }
 0x11a   :  { %v306_v22 = vpop.f32.mrf.mxu2 }
 0x11b   :  { %v319_v23 = vpop.f32.mrf.mxu3  ;;  %491 = vmatmul.bf16.vlgmr.msrb.gmra.mxu2 %v349_v21 }
 0x198   :  { %v505_v24 = vpop.f32.mrf.mxu3 }
 0x19e   :  { %v492_v26 = vpop.f32.mrf.mxu2 }
 0x19f   :  { %v493_v27 = vadd.f32 %v773_v25, %v492_v26 }
 0x1a0   :  { %v507_v28 = vpop.f32.mrf.mxu3 }
 0x1a1   :  { %v506_v29 = vadd.f32 %v505_v24, %v493_v27 }
 0x1a3   :  { %774 = vtanh.f32 %v506_v29 }
 0x1a6   :  { %v494_v30 = vpop.f32.mrf.mxu2 }
 0x1a9   :  { %v775_v31 = vpop.eup %774 }
 0x1aa   :  { %v510_v32 = vmul.f32 2.0, %v775_v31 }
 0x1ac   :  { %512 = vst.msk [vmem:[%s932_s7] sm:$0xff] %vm511_vm1, %v510_v32 }
 0x1ad   :  { %517 = vsyncpa [#allocation3], 1 }

</bundles_post_ra>
